<compile_context>
chip_gen: v7x
topology: tpu7x:2x2x1
jax: 0.10.0
libtpu: 0.0.40
codegen_flags: <defaults>
</compile_context>

<pallas_src>
import functools
import math

import jax
import jax.numpy as jnp
from jax import lax
from jax.experimental import pallas as pl
from jax.experimental.pallas import tpu as pltpu


def _attention_head_kernel(x_ref, bias_ref, wqkv_ref, bqkv_ref, o_ref,
                           *, compute_dtype):
    # x_ref:    (Bt*S, W)   flattened rows for this grid step
    # bias_ref: (Bt, 1, S)  additive mask bias (0 keep, -1e30 masked)
    # wqkv_ref: (W, 3H)     fused [Wq*scale | Wk | Wv]
    # bqkv_ref: (1, 3H)     fused [bq*scale | bk | bv]
    # o_ref:    (Bt*S, H)
    Bt, _, S = bias_ref.shape
    H3 = bqkv_ref.shape[1]
    H = H3 // 3

    # ---- fused QKV projection: one big-M MXU matmul ------------------------
    x2 = x_ref[...].astype(compute_dtype)                             # (Bt*S, W)
    w = wqkv_ref[...].astype(compute_dtype)                           # (W, 3H)
    qkv = jnp.dot(x2, w, preferred_element_type=jnp.float32)          # (Bt*S, 3H)
    qkv = qkv + bqkv_ref[...]                                         # bias broadcast
    qkv = qkv.reshape(Bt, S, H3)                                      # split leading dim (free)

    q = qkv[:, :, 0 * H:1 * H]                                        # (Bt, S, H), pre-scaled
    k = qkv[:, :, 1 * H:2 * H]
    v = qkv[:, :, 2 * H:3 * H]

    # ---- scores: contract last dims (MXU-native, no XLU transpose) ---------
    attn = lax.dot_general(
        q.astype(compute_dtype), k.astype(compute_dtype),
        dimension_numbers=(((2,), (2,)), ((0,), (0,))),
        preferred_element_type=jnp.float32)                           # (Bt, S, S)

    # ---- additive mask bias, broadcast along the query axis ----------------
    attn = attn + bias_ref[...]                                       # (Bt,1,S) -> (Bt,S,S)

    # ---- softmax along key axis, all f32 ------------------------------------
    m = jnp.max(attn, axis=-1, keepdims=True)
    p = jnp.exp(attn - m)
    denom = jnp.sum(p, axis=-1, keepdims=True)
    probs = p * pl.reciprocal(denom, approx=True)                     # EUP vrcp

    # ---- attention @ V ------------------------------------------------------
    out = lax.dot_general(
        probs.astype(compute_dtype), v.astype(compute_dtype),
        dimension_numbers=(((2,), (1,)), ((0,), (0,))),
        preferred_element_type=jnp.float32)                           # (Bt, S, H)
    o_ref[...] = out.reshape(Bt * S, H).astype(o_ref.dtype)           # merge leading dims (free)


def _pick_batch_tile(B, S):
    """Largest divisor of B such that Bt*S is around the MXU row count (256)."""
    target = max(1, 256 // max(S, 1))
    bt = 1
    for d in range(1, B + 1):
        if B % d == 0 and d <= target:
            bt = d
    return bt


def attention_head(x, params, mask=None, *, compute_dtype=jnp.float32):
    """x: (B, S, W) float32; mask: optional (B, S) with 0 == masked out.

    Set compute_dtype=jnp.bfloat16 on v6e/v7x for full-rate MXU matmuls
    (softmax math stays f32 inside the kernel).
    """
    B, S, W = x.shape
    H = params["wq"].shape[1]
    scale = jnp.float32(1.0 / math.sqrt(H))

    # Fuse the three projections into one weight/bias tile; fold the score
    # scale into the Q projection so the kernel never scales the score tile.
    wqkv = jnp.concatenate(
        [params["wq"] * scale, params["wk"], params["wv"]], axis=1)   # (W, 3H)
    bqkv = jnp.concatenate(
        [params["bq"] * scale, params["bk"], params["bv"]], axis=1)   # (1, 3H)

    # Additive mask bias: 0 = keep, -1e30 = masked (finite, so fully-masked
    # rows give a uniform softmax instead of NaN).
    if mask is None:
        bias = jnp.zeros((B, 1, S), dtype=jnp.float32)
    else:
        bias = jnp.where(mask.reshape(B, 1, S) == 0,
                         jnp.float32(-1e30), jnp.float32(0.0))

    Bt = _pick_batch_tile(B, S)

    kernel = functools.partial(_attention_head_kernel,
                               compute_dtype=compute_dtype)

    x2 = x.reshape(B * S, W)

    out_flat = pl.pallas_call(
        kernel,
        out_shape=jax.ShapeDtypeStruct((B * S, H), x.dtype),
        grid_spec=pltpu.PrefetchScalarGridSpec(
            num_scalar_prefetch=0,
            grid=(B // Bt,),
            in_specs=[
                pl.BlockSpec((Bt * S, W), lambda i: (i, 0)),      # x (flattened)
                pl.BlockSpec((Bt, 1, S), lambda i: (i, 0, 0)),    # mask bias
                pl.BlockSpec((W, 3 * H), lambda i: (0, 0)),       # fused wqkv
                pl.BlockSpec((1, 3 * H), lambda i: (0, 0)),       # fused bqkv
            ],
            out_specs=pl.BlockSpec((Bt * S, H), lambda i: (i, 0)),
        ),
        compiler_params=pltpu.CompilerParams(
            dimension_semantics=("parallel",)),
    )(x2, bias, wqkv, bqkv)

    return out_flat.reshape(B, S, H)


def init_params(key, width, head_size):
    """Deterministic init mimicking nn.Linear's uniform(-1/sqrt(fan_in), ...)."""
    ks = jax.random.split(key, 6)
    bound = 1.0 / math.sqrt(width)
    u = lambda k, shape: jax.random.uniform(k, shape, jnp.float32, -bound, bound)
    return {
        "wq": u(ks[0], (width, head_size)), "bq": u(ks[1], (1, head_size)),
        "wk": u(ks[2], (width, head_size)), "bk": u(ks[3], (1, head_size)),
        "wv": u(ks[4], (width, head_size)), "bv": u(ks[5], (1, head_size)),
    }


def attention_head_ref(x, params, mask=None):
    """Pure-JAX reference mirroring the PyTorch forward."""
    B, S, W = x.shape
    H = params["wq"].shape[1]
    q = x @ params["wq"] + params["bq"]
    k = x @ params["wk"] + params["bk"]
    v = x @ params["wv"] + params["bv"]
    attn = jnp.einsum("bqd,bkd->bqk", q, k) / math.sqrt(H)
    if mask is not None:
        m = jnp.broadcast_to(mask[:, None, :], (B, S, S))
        attn = jnp.where(m == 0, -jnp.inf, attn)
    attn = jax.nn.softmax(attn, axis=-1)
    return attn @ v


if __name__ == "__main__":
    key = jax.random.PRNGKey(0)
    B, S, W, H = 2, 8, 32, 16

    kx, kp, km = jax.random.split(key, 3)
    x = jax.random.normal(kx, (B, S, W), dtype=jnp.float32)
    params = init_params(kp, W, H)

    # mask: keep first few tokens valid per batch (never fully-masked rows)
    mask = (jnp.arange(S)[None, :] < jnp.array([[S], [S - 3]])).astype(jnp.int32)

    # Tolerance accounts for the approx (EUP) reciprocal in the softmax.
    TOL = dict(atol=2e-3, rtol=2e-3)

    # with mask
    out = jax.block_until_ready(attention_head(x, params, mask))
    ref = attention_head_ref(x, params, mask)
    assert jnp.allclose(out, ref, **TOL), "mismatch (masked)"

    # without mask (mask=None path)
    out2 = jax.block_until_ready(attention_head(x, params, None))
    ref2 = attention_head_ref(x, params, None)
    assert jnp.allclose(out2, ref2, **TOL), "mismatch (unmasked)"

    # fully-masked batch: kernel must stay finite (uniform softmax), no NaNs
    mask_full = mask.at[1, :].set(0)
    out3 = jax.block_until_ready(attention_head(x, params, mask_full))
    assert bool(jnp.isfinite(out3).all()), "NaN/inf on fully-masked row"

    print("KERNEL_OK")
</pallas_src>

<mosaic_0001>
module attributes {stable_mosaic.version = 11 : i64} {
  func.func @_attention_head_kernel(%arg0: i32, %arg1: memref<16x32xf32, #tpu.memory_space<vmem>>, %arg2: memref<2x1x8xf32, #tpu.memory_space<vmem>>, %arg3: memref<32x48xf32, #tpu.memory_space<vmem>>, %arg4: memref<1x48xf32, #tpu.memory_space<vmem>>, %arg5: memref<16x16xf32, #tpu.memory_space<vmem>>) attributes {dimension_semantics = [#tpu.dimension_semantics<parallel>], iteration_bounds = array<i64: 1>, scalar_prefetch = 0 : i64, scratch_operands = 0 : i64, tpu.core_type = #tpu.core_type<tc>, window_params = [{transform_indices = @transform_0, window_bounds = array<i64: 16, 32>}, {transform_indices = @transform_1, window_bounds = array<i64: 2, 1, 8>}, {pipeline_mode = #tpu.pipeline_mode<synchronous>, transform_indices = @transform_2, window_bounds = array<i64: 32, 48>}, {pipeline_mode = #tpu.pipeline_mode<synchronous>, transform_indices = @transform_3, window_bounds = array<i64: 1, 48>}, {transform_indices = @transform_4, window_bounds = array<i64: 16, 16>}]} {
    %c0 = arith.constant 0 : index
    %c0_0 = arith.constant 0 : index
    %0 = vector.load %arg1[%c0, %c0_0] : memref<16x32xf32, #tpu.memory_space<vmem>>, vector<16x32xf32>
    %c0_1 = arith.constant 0 : index
    %c0_2 = arith.constant 0 : index
    %1 = vector.load %arg3[%c0_1, %c0_2] : memref<32x48xf32, #tpu.memory_space<vmem>>, vector<32x48xf32>
    %cst = arith.constant dense<0.000000e+00> : vector<16x48xf32>
    %2 = tpu.matmul %0, %1, %cst {dimension_numbers = #tpu.dot_dimension_numbers<[1], [0], [0], [1], [0, 0, 1, 1], [], []>} : vector<16x32xf32>, vector<32x48xf32>, vector<16x48xf32> -> vector<16x48xf32>
    %c0_3 = arith.constant 0 : index
    %c0_4 = arith.constant 0 : index
    %3 = vector.load %arg4[%c0_3, %c0_4] : memref<1x48xf32, #tpu.memory_space<vmem>>, vector<1x48xf32>
    %4 = vector.broadcast %3 : vector<1x48xf32> to vector<16x48xf32>
    %5 = arith.addf %2, %4 : vector<16x48xf32>
    %6 = vector.shape_cast %5 : vector<16x48xf32> to vector<2x8x48xf32>
    %7 = vector.extract_strided_slice %6 {offsets = [0, 0, 0], sizes = [2, 8, 16], strides = [1, 1, 1]} : vector<2x8x48xf32> to vector<2x8x16xf32>
    %8 = vector.extract_strided_slice %6 {offsets = [0, 0, 16], sizes = [2, 8, 16], strides = [1, 1, 1]} : vector<2x8x48xf32> to vector<2x8x16xf32>
    %9 = vector.extract_strided_slice %6 {offsets = [0, 0, 32], sizes = [2, 8, 16], strides = [1, 1, 1]} : vector<2x8x48xf32> to vector<2x8x16xf32>
    %cst_5 = arith.constant dense<0.000000e+00> : vector<2x8x8xf32>
    %10 = tpu.matmul %7, %8, %cst_5 {dimension_numbers = #tpu.dot_dimension_numbers<[2], [2], [1], [1], [0, 0, 0, 1, 1, 1], [0], [0]>} : vector<2x8x16xf32>, vector<2x8x16xf32>, vector<2x8x8xf32> -> vector<2x8x8xf32>
    %c0_6 = arith.constant 0 : index
    %c0_7 = arith.constant 0 : index
    %c0_8 = arith.constant 0 : index
    %11 = vector.load %arg2[%c0_6, %c0_7, %c0_8] : memref<2x1x8xf32, #tpu.memory_space<vmem>>, vector<2x1x8xf32>
    %12 = vector.broadcast %11 : vector<2x1x8xf32> to vector<2x8x8xf32>
    %13 = arith.addf %10, %12 : vector<2x8x8xf32>
    %cst_9 = arith.constant dense<0xFF800000> : vector<2x8xf32>
    %14 = vector.multi_reduction <maximumf>, %13, %cst_9 [2] : vector<2x8x8xf32> to vector<2x8xf32>
    %15 = vector.shape_cast %14 : vector<2x8xf32> to vector<2x8x1xf32>
    %16 = vector.broadcast %15 : vector<2x8x1xf32> to vector<2x8x8xf32>
    %17 = arith.subf %13, %16 : vector<2x8x8xf32>
    %18 = math.exp %17 : vector<2x8x8xf32>
    %cst_10 = arith.constant dense<0.000000e+00> : vector<2x8xf32>
    %19 = vector.multi_reduction <add>, %18, %cst_10 [2] : vector<2x8x8xf32> to vector<2x8xf32>
    %20 = vector.shape_cast %19 : vector<2x8xf32> to vector<2x8x1xf32>
    %21 = tpu.reciprocal %20 {approx = true} : vector<2x8x1xf32> -> vector<2x8x1xf32>
    %22 = vector.broadcast %21 : vector<2x8x1xf32> to vector<2x8x8xf32>
    %23 = arith.mulf %18, %22 : vector<2x8x8xf32>
    %cst_11 = arith.constant dense<0.000000e+00> : vector<2x8x16xf32>
    %24 = tpu.matmul %23, %9, %cst_11 {dimension_numbers = #tpu.dot_dimension_numbers<[2], [1], [1], [2], [0, 0, 0, 1, 1, 2], [0], [0]>} : vector<2x8x8xf32>, vector<2x8x16xf32>, vector<2x8x16xf32> -> vector<2x8x16xf32>
    %25 = vector.shape_cast %24 : vector<2x8x16xf32> to vector<16x16xf32>
    %c0_12 = arith.constant 0 : index
    %c0_13 = arith.constant 0 : index
    %26 = vector.load %arg5[%c0_12, %c0_13] : memref<16x16xf32, #tpu.memory_space<vmem>>, vector<16x16xf32>
    tpu.vector_store %arg5[%c0_12, %c0_13], %25 {strides = array<i32>} : memref<16x16xf32, #tpu.memory_space<vmem>>, vector<16x16xf32>,
    return
  }
  func.func @transform_0(%arg0: i32) -> (i32, i32) {
    %c0_i32 = arith.constant 0 : i32
    %c0_i32_0 = arith.constant 0 : i32
    return %arg0, %c0_i32 : i32, i32
  }
  func.func @transform_1(%arg0: i32) -> (i32, i32, i32) {
    %c0_i32 = arith.constant 0 : i32
    %c0_i32_0 = arith.constant 0 : i32
    %c0_i32_1 = arith.constant 0 : i32
    return %arg0, %c0_i32, %c0_i32_0 : i32, i32, i32
  }
  func.func @transform_2(%arg0: i32) -> (i32, i32) {
    %c0_i32 = arith.constant 0 : i32
    %c0_i32_0 = arith.constant 0 : i32
    %c0_i32_1 = arith.constant 0 : i32
    return %c0_i32, %c0_i32_0 : i32, i32
  }
  func.func @transform_3(%arg0: i32) -> (i32, i32) {
    %c0_i32 = arith.constant 0 : i32
    %c0_i32_0 = arith.constant 0 : i32
    %c0_i32_1 = arith.constant 0 : i32
    return %c0_i32, %c0_i32_0 : i32, i32
  }
  func.func @transform_4(%arg0: i32) -> (i32, i32) {
    %c0_i32 = arith.constant 0 : i32
    %c0_i32_0 = arith.constant 0 : i32
    return %arg0, %c0_i32 : i32, i32
  }
}

</mosaic_0001>

<bundles_post_ra>
// kernel: tpu_custom_call.1
= control target key start
LH: loop header
LB: loop body
LE: loop exit
PB: predicated region body
PF: predicated region fallthrough
CT: control target
= control target key end

     0   :  { %9 = vsyncpa [#allocation3], 0  ;;  %s762_s0 = inlined_call_operand.hbm [shape: f32[16,32], index: 0, kind: input, shape index: {}]   ;;  %s763_s1 = inlined_call_operand.vmem [shape: f32[2,1,8], index: 1, kind: input, shape index: {}]   ;;  %s764_s2 = inlined_call_operand.hbm [shape: f32[32,48], index: 2, kind: input, shape index: {}]   ;;  %s765_s3 = inlined_call_operand.vmem [shape: f32[1,48], index: 3, kind: input, shape index: {}]   ;;  %s766_s4 = inlined_call_operand.hbm [shape: f32[16,16], index: 4, kind: output, shape index: {}]  }
   0x1   :  { %10 = vsyncpa [#allocation6], 0 }
   0x2   :  { %11 = vsyncpa [#allocation4], 0  ;;  %s658_s15 = smov [#allocation2]   ;;  %s586_s19 = scalar_lea.hbm %s762_s0, 256 }
   0x3   :  { %s17_s16 = sshll.u32 %s658_s15, 4  ;;  %p587_p0 = scmp.ne.s32.totalorder %s762_s0, %s586_s19  ;;  %s18_s16 = int_to_ptr.vmem [resolvable:$true] %s17_s16 }
   0x4   :  { %p590_p1 = scmp.lt.u32.totalorder %s586_s19, %s762_s0 }
   0x6   :  { %p592_p2 = pnand %p590_p1, %p587_p0 }
   0x8   :  { %595 = shalt.err (!%p592_p2)
}
   0x9   :  { %s596_s24 = scalar_lea.vmem %s18_s16, 256  ;;  %p601_p4 = scmp.lt.s32.totalorder %s18_s16, %s18_s16 }
   0xa   :  { %p597_p3 = scmp.ne.s32.totalorder %s18_s16, %s596_s24  ;;  %p602_p5 = scmp.lt.s32.totalorder %s596_s24, %s596_s24 }
   0xc   :  { %p603_p6 = por %p602_p5, %p601_p4 }
   0xe   :  { %p604_p7 = pnand %p603_p6, %p597_p3 }
  0x10   :  { %607 = shalt.err (!%p604_p7)
}
  0x11   :  { %s659_s25 = smov 128   ;;  %s660_s26 = smov 8  }
  0x12   :  { %23 = dma.hbm_to_vmem [thread:$0]  %s762_s0, 256, %s18_s16, [#allocation3], %s659_s25, %s659_s25, %s660_s26  }
  0x13   :  { %s661_s29 = smov [#allocation5]   ;;  %s608_s7 = scalar_lea.hbm %s764_s2, 512 }
  0x14   :  { %s31_s30 = sshll.u32 %s661_s29, 4  ;;  %p609_p8 = scmp.ne.s32.totalorder %s764_s2, %s608_s7  ;;  %s32_s30 = int_to_ptr.vmem [resolvable:$true] %s31_s30 }
  0x15   :  { %p612_p9 = scmp.lt.u32.totalorder %s608_s7, %s764_s2 }
  0x17   :  { %p614_p10 = pnand %p612_p9, %p609_p8 }
  0x19   :  { %617 = shalt.err (!%p614_p10)
}
  0x1a   :  { %s618_s12 = scalar_lea.vmem %s32_s30, 512  ;;  %p623_p12 = scmp.lt.s32.totalorder %s32_s30, %s32_s30 }
  0x1b   :  { %p619_p11 = scmp.ne.s32.totalorder %s32_s30, %s618_s12  ;;  %p624_p13 = scmp.lt.s32.totalorder %s618_s12, %s618_s12 }
  0x1d   :  { %p625_p0 = por %p624_p13, %p623_p12 }
  0x1f   :  { %p626_p1 = pnand %p625_p0, %p619_p11 }
  0x21   :  { %629 = shalt.err (!%p626_p1)
}
  0x22   :  { %37 = dma.hbm_to_vmem [thread:$0]  %s764_s2, 512, %s32_s30, [#allocation6], %s659_s25, %s659_s25, %s660_s26  }
  0x23   :  { %652 = dma.done.wait [#allocation3], 256  }
  0x24   :  { %653 = vsyncadd [#allocation3], 4294967040 }
  0x25   :  { %654 = dma.done.wait [#allocation6], 512  }
  0x26   :  { %655 = vsyncadd [#allocation6], 4294966784  ;;  %vm59_vm0 = vcmask 261120   ;;  %v48_v0 = vld [vmem:[#allocation5] sm:$0xff]  ;;  %v49_v1 = vld [vmem:[#allocation5 + $0x8] sm:$0xff]  ;;  %v662_v8 = vmov 0.0  }
  0x27   :  { %v50_v2 = vld [vmem:[#allocation5 + $0x10] sm:$0xff]  ;;  %v561_v3 = vpack.c.bf16 %v49_v1, %v48_v0  ;;  %v51_v4 = vld [vmem:[#allocation5 + $0x18] sm:$0xff]  ;;  %541 = vmatprep.subr.mxu1 %v662_v8  ;;  %vm663_vm1 = vmmov 0   ;;  %s664_s15 = smov 112   ;;  %vm158_vm2 = vcmask 130048   ;;  %vm310_vm3 = vcmask 64512  }
  0x28   :  { %v46_v5 = vld [vmem:[#allocation2] sm:$0xff]  ;;  %v565_v6 = vpack.c.bf16 %v51_v4, %v50_v2  ;;  %v47_v7 = vld [vmem:[#allocation2 + $0x8] sm:$0xff]  ;;  %543 = vmatprep.mubr.msk.f32.mxu1 %vm663_vm1, %v662_v8  ;;  %s665_s19 = smov 96  }
  0x29   :  { %538 = vmatprep.mubr.msk.f32.mxu0 %vm59_vm0, %v46_v5  ;;  %562 = vmatprep.subr.bf16.mxu0 %v561_v3  ;;  %v505_v9 = vld [vmem:[%s765_s3] ss:$0 sm:$0xff]  ;;  %v509_v20 = vld [vmem:[%s763_s1 + $0x1] ss:$0 sm:$0xff] }
  0x2a   :  { %564 = vmatpush3.bf16.msra.mxu0 %v561_v3  ;;  %v508_v16 = vld [vmem:[%s763_s1] ss:$0 sm:$0xff]  ;;  %s666_s1 = smov [#allocation7]  }
  0x2b   :  { %566 = vmatprep.subr.bf16.mxu0 %v565_v6  ;;  %s492_s20 = sshll.u32 %s666_s1, 4  ;;  %s493_s20 = int_to_ptr.vmem [resolvable:$true] %s492_s20 }
  0x2c   :  { %s630_s21 = scalar_lea.vmem %s493_s20, 256  ;;  %p635_p3 = scmp.lt.s32.totalorder %s493_s20, %s493_s20 }
  0x2d   :  { %p631_p2 = scmp.ne.s32.totalorder %s493_s20, %s630_s21  ;;  %p636_p4 = scmp.lt.s32.totalorder %s630_s21, %s630_s21 }
  0x2e   :  { %568 = vmatpush3.bf16.msra.mxu0 %v565_v6 }
  0x2f   :  { %551 = vmatprep.subr.mxu0 %v662_v8  ;;  %p637_p5 = por %p636_p4, %p635_p3 }
  0x31   :  { %539 = vmatmul.mubr.msk.f32.vlgmr.msra.gmra.mrb[0].mxu0 %vm59_vm0, %v47_v7  ;;  %p638_p6 = pnand %p637_p5, %p631_p2 }
  0x32   :  { %553 = vmatprep.mubr.msk.f32.mxu0 %vm663_vm1, %v662_v8 }
 0x104   :  { %v540_v10 = vpop.f32.mrb[0].mxu0 }
 0x105   :  { %v132_v11 = vpop.f32.mrb[1].mxu0  ;;  %v138_v13 = vadd.f32 %v540_v10, %v505_v9 }
 0x106   :  { %v133_v12 = vadd.f32 %v505_v9, %v132_v11 }
 0x108   :  { %156 = vrot.lane.b32.xlu0 %v133_v12, %s664_s15 }
 0x10c   :  { %234 = vrot.lane.b32.xlu0 %v138_v13, %s664_s15 }
 0x17a   :  { %v157_v14 = vpop.permute.xlu0 %156 }
 0x17b   :  { %542 = vmatpush3.xpose.msk.msra.mxu1 %vm158_vm2, %v157_v14 }
 0x17c   :  { %546 = vmatprep.subr.mxu1 %v662_v8 }
 0x17e   :  { %544 = vmatmul.mubr.msk.f32.vlgmr.msra.gmra.mrb[0].mxu1 %vm158_vm2, %v133_v12  ;;  %v235_v15 = vpop.permute.xlu0 %234 }
 0x17f   :  { %547 = vmatpush3.xpose.msk.msra.mxu1 %vm158_vm2, %v235_v15  ;;  %548 = vmatprep.mubr.msk.f32.mxu1 %vm663_vm1, %v662_v8 }
 0x180   :  { %556 = vmatprep.subr.mxu1 %v662_v8 }
 0x182   :  { %549 = vmatmul.mubr.msk.f32.vlgmr.msra.gmra.mrb[2].mxu1 %vm158_vm2, %v138_v13 }
 0x183   :  { %558 = vmatprep.mubr.msk.f32.mxu1 %vm663_vm1, %v662_v8 }
 0x251   :  { %v229_v17 = vpop.f32.mrb[0].mxu1 }
 0x252   :  { %v230_v18 = vadd.f32 %v508_v16, %v229_v17  ;;  %v545_v19 = vpop.f32.mrb[1].mxu1 }
 0x254   :  { %v311_v21 = vsel %vm310_vm3, %v230_v18, -inf }
 0x255   :  { %312 = vmax.xlane.f32.xlu1 %v311_v21  ;;  %v306_v22 = vpop.f32.mrb[2].mxu1 }
 0x256   :  { %v307_v23 = vadd.f32 %v509_v20, %v306_v22  ;;  %v550_v24 = vpop.f32.mrb[3].mxu1 }
 0x258   :  { %v314_v25 = vsel %vm310_vm3, %v307_v23, -inf }
 0x259   :  { %315 = vmax.xlane.f32.xlu1 %v314_v25 }
 0x26a   :  { %333 = vrot.lane.b32.xlu1 %v133_v12, %s665_s19 }
 0x2e2   :  { %v313_v26 = vpop.xlane.xlu1 %312 }
 0x2e3   :  { %v317_v27 = vsub.f32 %v230_v18, %v313_v26 }
 0x2e5   :  { %v319_v28 = vmul.f32 1.442695, %v317_v27 }
 0x2e6   :  { %v316_v29 = vpop.xlane.xlu1 %315 }
 0x2e7   :  { %578 = vpow2.f32 %v319_v28  ;;  %v318_v30 = vsub.f32 %v307_v23, %v316_v29 }
 0x2e9   :  { %v321_v31 = vmul.f32 1.442695, %v318_v30 }
 0x2ea   :  { %v334_v32 = vpop.permute.xlu1 %333 }
 0x2eb   :  { %580 = vpow2.f32 %v321_v31  ;;  %552 = vmatpush3.msra.mxu0 %v334_v32 }
 0x2f1   :  { %v579_v33 = vpop.eup %578 }
 0x2f2   :  { %v323_v34 = vsel %vm310_vm3, %v579_v33, 0.0 }
 0x2f3   :  { %324 = vadd.xlane.f32.xlu0 %v323_v34 }
 0x2f5   :  { %v581_v35 = vpop.eup %580 }
 0x2f6   :  { %v326_v36 = vsel %vm310_vm3, %v581_v35, 0.0 }
 0x2f7   :  { %327 = vadd.xlane.f32.xlu1 %v326_v36 }
 0x308   :  { %409 = vrot.lane.b32.xlu1 %v138_v13, %s665_s19 }
 0x380   :  { %v325_v37 = vpop.xlane.xlu0 %324 }
 0x381   :  { %582 = vrcp.f32 %v325_v37 }
 0x384   :  { %v328_v38 = vpop.xlane.xlu1 %327 }
 0x385   :  { %584 = vrcp.f32 %v328_v38 }
 0x388   :  { %v410_v39 = vpop.permute.xlu1 %409 }
 0x389   :  { %557 = vmatpush3.msra.mxu1 %v410_v39 }
 0x38b   :  { %v583_v40 = vpop.eup %582 }
 0x38c   :  { %v331_v41 = vmul.f32 %v583_v40, %v579_v33 }
 0x38e   :  { %554 = vmatmul.mubr.msk.f32.vlgmr.msra.gmra.mrb[2].mxu0 %vm310_vm3, %v331_v41 }
 0x38f   :  { %v585_v42 = vpop.eup %584 }
 0x390   :  { %v332_v43 = vmul.f32 %v585_v42, %v581_v35 }
 0x392   :  { %559 = vmatmul.mubr.msk.f32.vlgmr.msra.gmra.mrb[4].mxu1 %vm310_vm3, %v332_v43 }
 0x461   :  { %v405_v44 = vpop.f32.mrb[2].mxu0 }
 0x462   :  { %485 = vst.msk [vmem:[#allocation7] sm:$0xff] %vm158_vm2, %v405_v44  ;;  %v555_v45 = vpop.f32.mrb[3].mxu0 }
 0x465   :  { %v481_v46 = vpop.f32.mrb[4].mxu1 }
 0x466   :  { %486 = vst.msk [vmem:[#allocation7 + $0x8] sm:$0xff] %vm158_vm2, %v481_v46  ;;  %v560_v47 = vpop.f32.mrb[5].mxu1 }
 0x467   :  { %641 = shalt.err (!%p638_p6)
}
 0x468   :  { %s642_s24 = scalar_lea.hbm %s766_s4, 256 }
 0x469   :  { %p643_p7 = scmp.ne.s32.totalorder %s766_s4, %s642_s24  ;;  %p646_p8 = scmp.lt.u32.totalorder %s642_s24, %s766_s4 }
 0x46b   :  { %p648_p9 = pnand %p646_p8, %p643_p7 }
 0x46d   :  { %651 = shalt.err (!%p648_p9)
}
 0x46e   :  { %498 = dma.vmem_to_hbm [thread:$0]  %s493_s20, 256, %s766_s4, [#allocation4], %s659_s25, %s659_s25, %s660_s26  }
 0x46f   :  { %656 = dma.done.wait [#allocation4], 256  }
 0x470   :  { %657 = vsyncadd [#allocation4], 4294967040 }
 0x471   :  { %502 = vsyncpa [#allocation3], 1 }
 0x472   :  { %503 = vsyncpa [#allocation6], 1 }
 0x473   :  { %504 = vsyncpa [#allocation4], 1 }

</bundles_post_ra>
